<compile_context>
chip_gen: v7x
topology: tpu7x:2x2x1
jax: 0.10.0
libtpu: 0.0.40
codegen_flags: <defaults>
</compile_context>

<pallas_src>
import functools

import jax
import jax.numpy as jnp
from jax.experimental import pallas as pl
from jax.experimental.pallas import tpu as pltpu

_LANE = 128


# --------------------------------------------------------------------------
# Hardware queries (robust fallbacks: assume v7x-sized VMEM, 1 TensorCore).
# --------------------------------------------------------------------------
def _vmem_capacity_bytes():
    try:
        cap = pltpu.get_tpu_info().vmem_capacity_bytes
        if isinstance(cap, int) and cap > 0:
            return max(32 << 20, min(cap, 256 << 20))
    except Exception:
        pass
    return 64 << 20  # conservative: v7x per-TensorCore VMEM


def _num_tensorcores_per_chip():
    try:
        info = pltpu.get_tpu_info()
        for name in ("num_cores", "core_count", "tensorcores_per_chip",
                     "num_tensorcores", "cores_per_chip"):
            v = getattr(info, name, None)
            if isinstance(v, int) and 1 <= v <= 8:
                return v
    except Exception:
        pass
    try:
        kind = jax.devices()[0].device_kind.lower()
        if "v7" in kind or "7x" in kind:
            return 2
    except Exception:
        pass
    return 1


# --------------------------------------------------------------------------
# Tiling heuristics.
# --------------------------------------------------------------------------
def _largest_divisor_leq(n, cap):
    cap = max(1, min(cap, n))
    for d in range(cap, 0, -1):
        if n % d == 0:
            return d
    return 1


def _pick_batch_tile(batch, num_tc, max_bt=8):
    # Exact divisor of B -> no batch padding, no extra HBM pass.
    bt = _largest_divisor_leq(batch, max_bt)
    # Only split for parallelism on multi-TensorCore chips (v7x); on v5e/v6e
    # the grid is a serial loop and splitting just shrinks the DMA slabs.
    if num_tc >= 2 and batch >= num_tc and (batch // bt) < num_tc:
        bt = _largest_divisor_leq(batch, batch // num_tc)
    return bt


def _pick_spatial_tile(hw, c, bt, itemsize, target_bytes, full_slab_bytes):
    slab = bt * c * hw * itemsize
    if slab <= full_slab_bytes or hw <= _LANE:
        return hw                                   # one spatial step, no mask
    per_lane = max(1, bt * c * itemsize)
    max_thw = max(_LANE, target_bytes // per_lane)
    thw = max(_LANE, (max_thw // _LANE) * _LANE)    # lane-aligned tile
    return min(thw, hw) if thw < hw else hw


# --------------------------------------------------------------------------
# Kernel helpers.
# --------------------------------------------------------------------------
def _column_partials(x_ref, n_cols, bt, c, dt):
    """(Bt, C, 128) lane-width sum(f32)/max(dt) partials over n_cols aligned
    128-lane columns of x_ref. Pure VPU adds/max; no cross-lane reduce."""
    zero = jnp.zeros((bt, c, _LANE), jnp.float32)
    ninf = jnp.full((bt, c, _LANE), -jnp.inf, dt)
    if n_cols == 0:
        return zero, ninf

    if n_cols <= 8:          # short loop: fully unrolled, static starts
        col0 = x_ref[:, :, pl.ds(0, _LANE)]
        ls, lm = col0.astype(jnp.float32), col0
        for g in range(1, n_cols):
            col = x_ref[:, :, pl.ds(g * _LANE, _LANE)]
            ls = ls + col.astype(jnp.float32)
            lm = jnp.maximum(lm, col)
        return ls, lm

    def body(g, carry):
        ls, lm = carry
        col = x_ref[:, :, pl.ds(pl.multiple_of(g * _LANE, _LANE), _LANE)]
        return ls + col.astype(jnp.float32), jnp.maximum(lm, col)

    return jax.lax.fori_loop(0, n_cols, body, (zero, ninf))


def _mlp_store(avg, mx, w1t_ref, w2t_ref, out_ref):
    # Shared MLP applied to both pooled stats in one lane-dense (2*Bt, C) slab.
    v = jnp.concatenate([avg, mx], axis=0)                     # (2*Bt, C)
    h = jnp.dot(v, w1t_ref[...], preferred_element_type=jnp.float32)
    h = jnp.maximum(h, 0.0)                                    # ReLU
    o = jnp.dot(h, w2t_ref[...], preferred_element_type=jnp.float32)
    bt = avg.shape[0]
    out_ref[...] = jax.nn.sigmoid(o[:bt] + o[bt:]).astype(out_ref.dtype)


# --------------------------------------------------------------------------
# Kernels.
# --------------------------------------------------------------------------
def _channel_attn_single_kernel(x_ref, w1t_ref, w2t_ref, out_ref, *, hw):
    # Whole spatial extent in one block: no scratch, no accumulation loop.
    bt, c, _ = x_ref.shape
    if hw % _LANE == 0:
        ps, pm = _column_partials(x_ref, hw // _LANE, bt, c, x_ref.dtype)
        total = jnp.sum(ps, axis=-1)                           # (Bt, C) f32
        mx = jnp.max(pm, axis=-1).astype(jnp.float32)
    else:
        x = x_ref[...]
        total = jnp.sum(x.astype(jnp.float32), axis=-1)
        mx = jnp.max(x, axis=-1).astype(jnp.float32)
    _mlp_store(total * (1.0 / hw), mx, w1t_ref, w2t_ref, out_ref)


def _channel_attn_multi_kernel(x_ref, w1t_ref, w2t_ref, out_ref, sum_acc,
                               max_acc, *, hw, thw, ns, needs_mask):
    # x_ref  : (Bt, C, THW) current (batch-block, spatial-block) slab
    # sum_acc: (Bt, C, 128) f32 lane-partial running sum
    # max_acc: (Bt, C, 128) x-dtype lane-partial running max
    s = pl.program_id(1)
    bt, c, _ = x_ref.shape
    dt = x_ref.dtype

    @pl.when(s == 0)
    def _init():
        sum_acc[...] = jnp.zeros_like(sum_acc)
        max_acc[...] = jnp.full_like(max_acc, -jnp.inf)

    def accumulate(n_full, rem):
        ps, pm = _column_partials(x_ref, n_full, bt, c, dt)
        if rem > 0:                       # single partially-valid 128-lane column
            start = n_full * _LANE
            col = x_ref[:, :, pl.ds(start, _LANE)]
            lane = jax.lax.broadcasted_iota(jnp.int32, col.shape, 2)
            valid = lane < rem
            ps = ps + jnp.where(valid, col, jnp.zeros_like(col)).astype(jnp.float32)
            pm = jnp.maximum(pm, jnp.where(valid, col, jnp.full_like(col, -jnp.inf)))
        sum_acc[...] += ps
        max_acc[...] = jnp.maximum(max_acc[...], pm)

    if needs_mask:
        tail = hw - (ns - 1) * thw        # static valid count in last block

        @pl.when(s < ns - 1)
        def _full_steps():
            accumulate(thw // _LANE, 0)   # unmasked fast path

        @pl.when(s == ns - 1)
        def _last_step():
            accumulate(tail // _LANE, tail % _LANE)
    else:
        accumulate(thw // _LANE, 0)

    @pl.when(s == ns - 1)
    def _finalize():
        total = jnp.sum(sum_acc[...], axis=-1)                 # one lane reduce
        mx = jnp.max(max_acc[...], axis=-1).astype(jnp.float32)
        _mlp_store(total * (1.0 / hw), mx, w1t_ref, w2t_ref, out_ref)


# --------------------------------------------------------------------------
# Wrapper.
# --------------------------------------------------------------------------
def channel_attention(x, w1, w2, *, max_batch_tile=8):
    """CBAM channel attention.

    x : (B, C, H, W) activations (any float dtype; sums accumulate in f32)
    w1: (C//r, C)    f1 weight squeezed from (C//r, C, 1, 1)
    w2: (C, C//r)    f2 weight squeezed from (C, C//r, 1, 1)
    returns (B, C, 1, 1) sigmoid attention map with x.dtype.
    """
    B, C, H, W = x.shape
    hidden = w1.shape[0]
    HW = H * W
    itemsize = jnp.dtype(x.dtype).itemsize

    num_tc = _num_tensorcores_per_chip()
    capacity = _vmem_capacity_bytes()
    # v5e/v6e (128 MiB) -> ~12 MiB tiles; v7x (64 MiB) -> ~8 MiB tiles.
    target_bytes = min(12 << 20, max(6 << 20, capacity // 8))
    full_slab_bytes = max(target_bytes, (capacity - (12 << 20)) // 2)

    Bt = _pick_batch_tile(B, num_tc, max_batch_tile)
    nb = B // Bt                                      # exact; no batch padding
    THW = _pick_spatial_tile(HW, C, Bt, itemsize, target_bytes, full_slab_bytes)
    ns = pl.cdiv(HW, THW)
    needs_mask = (HW % THW) != 0

    x3 = x.reshape(B, C, HW)                          # free reshape (contiguous)
    w1t = jnp.transpose(w1).astype(jnp.float32)       # (C, hidden)
    w2t = jnp.transpose(w2).astype(jnp.float32)       # (hidden, C)

    if ns == 1:
        kernel = functools.partial(_channel_attn_single_kernel, hw=HW)
        scratch = []
    else:
        kernel = functools.partial(_channel_attn_multi_kernel, hw=HW, thw=THW,
                                   ns=ns, needs_mask=needs_mask)
        scratch = [pltpu.VMEM((Bt, C, _LANE), jnp.float32),   # lane-partial sum
                   pltpu.VMEM((Bt, C, _LANE), x.dtype)]       # lane-partial max

    # VMEM plan: double-buffered x tile + weights + out + scratch + margin.
    x_tile_bytes = Bt * C * THW * itemsize
    w_bytes = 2 * C * hidden * 4
    out_tile_bytes = Bt * C * itemsize
    scratch_bytes = Bt * C * _LANE * (4 + itemsize) if ns > 1 else 0
    needed = (2 * x_tile_bytes + 2 * w_bytes + 2 * out_tile_bytes
              + scratch_bytes + (2 << 20))
    vmem_limit = int(min(capacity - (4 << 20), max(needed, 24 << 20)))

    out = pl.pallas_call(
        kernel,
        out_shape=jax.ShapeDtypeStruct((B, C), x.dtype),
        grid_spec=pltpu.PrefetchScalarGridSpec(
            num_scalar_prefetch=0,
            grid=(nb, ns),                            # (parallel, reduction-last)
            in_specs=[
                pl.BlockSpec((Bt, C, THW), lambda b, s: (b, 0, s)),
                pl.BlockSpec((C, hidden), lambda b, s: (0, 0)),
                pl.BlockSpec((hidden, C), lambda b, s: (0, 0)),
            ],
            out_specs=pl.BlockSpec((Bt, C), lambda b, s: (b, 0)),
            scratch_shapes=scratch,
        ),
        compiler_params=pltpu.CompilerParams(
            dimension_semantics=("parallel", "arbitrary"),
            vmem_limit_bytes=vmem_limit,
        ),
    )(x3, w1t, w2t)

    return out.reshape(B, C, 1, 1)


def reference_channel_attention(x, w1, w2):
    # Pure-JAX reference reproducing the PyTorch forward.
    avg = jnp.mean(x, axis=(2, 3))                    # (B, C)
    mx = jnp.max(x, axis=(2, 3))                      # (B, C)

    def mlp(p):
        return jnp.maximum(p @ w1.T, 0.0) @ w2.T

    return jax.nn.sigmoid(mlp(avg) + mlp(mx))[:, :, None, None]


if __name__ == "__main__":
    B, C, H, W = 2, 64, 16, 16
    ratio = 16
    hidden = C // ratio

    key = jax.random.PRNGKey(0)
    kx, k1, k2 = jax.random.split(key, 3)

    x = jax.random.normal(kx, (B, C, H, W), dtype=jnp.float32)
    # Conv2d(in, out, 1, bias=False) weights, squeezed from (out, in, 1, 1).
    w1 = jax.random.normal(k1, (hidden, C), dtype=jnp.float32) * (1.0 / jnp.sqrt(C))
    w2 = jax.random.normal(k2, (C, hidden), dtype=jnp.float32) * (1.0 / jnp.sqrt(hidden))

    out = channel_attention(x, w1, w2)
    out = jax.block_until_ready(out)

    ref = reference_channel_attention(x, w1, w2)
    assert out.shape == (B, C, 1, 1)
    assert jnp.allclose(out, ref, atol=1e-5, rtol=1e-5), "mismatch vs reference"

    print("KERNEL_OK")
</pallas_src>

<mosaic_0001>
module attributes {stable_mosaic.version = 11 : i64} {
  func.func @_channel_attn_single_kernel(%arg0: i32, %arg1: i32, %arg2: memref<2x64x256xf32, #tpu.memory_space<vmem>>, %arg3: memref<64x4xf32, #tpu.memory_space<vmem>>, %arg4: memref<4x64xf32, #tpu.memory_space<vmem>>, %arg5: memref<2x64xf32, #tpu.memory_space<vmem>>) attributes {dimension_semantics = [#tpu.dimension_semantics<parallel>, #tpu.dimension_semantics<arbitrary>], iteration_bounds = array<i64: 1, 1>, scalar_prefetch = 0 : i64, scratch_operands = 0 : i64, tpu.core_type = #tpu.core_type<tc>, window_params = [{transform_indices = @transform_0, window_bounds = array<i64: 2, 64, 256>}, {pipeline_mode = #tpu.pipeline_mode<synchronous>, transform_indices = @transform_1, window_bounds = array<i64: 64, 4>}, {pipeline_mode = #tpu.pipeline_mode<synchronous>, transform_indices = @transform_2, window_bounds = array<i64: 4, 64>}, {transform_indices = @transform_3, window_bounds = array<i64: 2, 64>}]} {
    %c0 = arith.constant 0 : index
    %c0_0 = arith.constant 0 : index
    %c0_1 = arith.constant 0 : index
    %0 = vector.load %arg2[%c0, %c0_0, %c0_1] : memref<2x64x256xf32, #tpu.memory_space<vmem>>, vector<2x64x128xf32>
    %c0_2 = arith.constant 0 : index
    %c0_3 = arith.constant 0 : index
    %c128 = arith.constant 128 : index
    %1 = vector.load %arg2[%c0_2, %c0_3, %c128] : memref<2x64x256xf32, #tpu.memory_space<vmem>>, vector<2x64x128xf32>
    %2 = arith.addf %0, %1 : vector<2x64x128xf32>
    %3 = arith.maximumf %0, %1 : vector<2x64x128xf32>
    %cst = arith.constant dense<0.000000e+00> : vector<2x64xf32>
    %4 = vector.multi_reduction <add>, %2, %cst [2] : vector<2x64x128xf32> to vector<2x64xf32>
    %cst_4 = arith.constant dense<0xFF800000> : vector<2x64xf32>
    %5 = vector.multi_reduction <maximumf>, %3, %cst_4 [2] : vector<2x64x128xf32> to vector<2x64xf32>
    %cst_5 = arith.constant 3.906250e-03 : f32
    %6 = vector.broadcast %cst_5 : f32 to vector<2x64xf32>
    %7 = arith.mulf %4, %6 : vector<2x64xf32>
    %8 = tpu.concatenate %7, %5 in 0 : vector<2x64xf32>, vector<2x64xf32> -> vector<4x64xf32>
    %c0_6 = arith.constant 0 : index
    %c0_7 = arith.constant 0 : index
    %9 = vector.load %arg3[%c0_6, %c0_7] : memref<64x4xf32, #tpu.memory_space<vmem>>, vector<64x4xf32>
    %cst_8 = arith.constant dense<0.000000e+00> : vector<4x4xf32>
    %10 = tpu.matmul %8, %9, %cst_8 {dimension_numbers = #tpu.dot_dimension_numbers<[1], [0], [0], [1], [0, 0, 1, 1], [], []>} : vector<4x64xf32>, vector<64x4xf32>, vector<4x4xf32> -> vector<4x4xf32>
    %cst_9 = arith.constant 0.000000e+00 : f32
    %11 = vector.broadcast %cst_9 : f32 to vector<4x4xf32>
    %12 = arith.maximumf %10, %11 : vector<4x4xf32>
    %c0_10 = arith.constant 0 : index
    %c0_11 = arith.constant 0 : index
    %13 = vector.load %arg4[%c0_10, %c0_11] : memref<4x64xf32, #tpu.memory_space<vmem>>, vector<4x64xf32>
    %cst_12 = arith.constant dense<0.000000e+00> : vector<4x64xf32>
    %14 = tpu.matmul %12, %13, %cst_12 {dimension_numbers = #tpu.dot_dimension_numbers<[1], [0], [0], [1], [0, 0, 1, 1], [], []>} : vector<4x4xf32>, vector<4x64xf32>, vector<4x64xf32> -> vector<4x64xf32>
    %15 = vector.extract_strided_slice %14 {offsets = [0, 0], sizes = [2, 64], strides = [1, 1]} : vector<4x64xf32> to vector<2x64xf32>
    %16 = vector.extract_strided_slice %14 {offsets = [2, 0], sizes = [2, 64], strides = [1, 1]} : vector<4x64xf32> to vector<2x64xf32>
    %17 = arith.addf %15, %16 : vector<2x64xf32>
    %18 = arith.negf %17 : vector<2x64xf32>
    %19 = math.exp %18 : vector<2x64xf32>
    %cst_13 = arith.constant 1.000000e+00 : f32
    %20 = vector.broadcast %cst_13 : f32 to vector<2x64xf32>
    %21 = arith.addf %20, %19 : vector<2x64xf32>
    %22 = arith.divf %20, %21 : vector<2x64xf32>
    %c0_14 = arith.constant 0 : index
    %c0_15 = arith.constant 0 : index
    %23 = vector.load %arg5[%c0_14, %c0_15] : memref<2x64xf32, #tpu.memory_space<vmem>>, vector<2x64xf32>
    tpu.vector_store %arg5[%c0_14, %c0_15], %22 {strides = array<i32>} : memref<2x64xf32, #tpu.memory_space<vmem>>, vector<2x64xf32>,
    return
  }
  func.func @transform_0(%arg0: i32, %arg1: i32) -> (i32, i32, i32) {
    %c0_i32 = arith.constant 0 : i32
    %c0_i32_0 = arith.constant 0 : i32
    return %arg0, %c0_i32, %arg1 : i32, i32, i32
  }
  func.func @transform_1(%arg0: i32, %arg1: i32) -> (i32, i32) {
    %c0_i32 = arith.constant 0 : i32
    %c0_i32_0 = arith.constant 0 : i32
    %c0_i32_1 = arith.constant 0 : i32
    return %c0_i32, %c0_i32_0 : i32, i32
  }
  func.func @transform_2(%arg0: i32, %arg1: i32) -> (i32, i32) {
    %c0_i32 = arith.constant 0 : i32
    %c0_i32_0 = arith.constant 0 : i32
    %c0_i32_1 = arith.constant 0 : i32
    return %c0_i32, %c0_i32_0 : i32, i32
  }
  func.func @transform_3(%arg0: i32, %arg1: i32) -> (i32, i32) {
    %c0_i32 = arith.constant 0 : i32
    %c0_i32_0 = arith.constant 0 : i32
    return %arg0, %c0_i32 : i32, i32
  }
}

</mosaic_0001>

<bundles_post_ra>
// kernel: tpu_custom_call.1
= control target key start
LH: loop header
LB: loop body
LE: loop exit
PB: predicated region body
PF: predicated region fallthrough
CT: control target
= control target key end

     0   :  { %8 = vsyncpa [#allocation3], 0  ;;  %s870_s0 = inlined_call_operand.hbm [shape: f32[2,64,256], index: 0, kind: input, shape index: {}]   ;;  %s871_s1 = inlined_call_operand.vmem [shape: f32[64,4], index: 1, kind: input, shape index: {}]   ;;  %s872_s2 = inlined_call_operand.vmem [shape: f32[4,64], index: 2, kind: input, shape index: {}]   ;;  %s873_s3 = inlined_call_operand.hbm [shape: f32[2,64], index: 3, kind: output, shape index: {}]  }
   0x1   :  { %9 = vsyncpa [#allocation4], 0  ;;  %s684_s12 = smov [#allocation2]   ;;  %s636_s16 = scalar_lea.hbm %s870_s0, 4096 }
   0x2   :  { %s15_s13 = sshll.u32 %s684_s12, 4  ;;  %p637_p0 = scmp.ne.s32.totalorder %s870_s0, %s636_s16  ;;  %s16_s13 = int_to_ptr.vmem [resolvable:$true] %s15_s13 }
   0x3   :  { %p640_p1 = scmp.lt.u32.totalorder %s636_s16, %s870_s0 }
   0x5   :  { %p642_p2 = pnand %p640_p1, %p637_p0 }
   0x7   :  { %645 = shalt.err (!%p642_p2)
}
   0x8   :  { %s646_s21 = scalar_lea.vmem %s16_s13, 4096  ;;  %p651_p4 = scmp.lt.s32.totalorder %s16_s13, %s16_s13 }
   0x9   :  { %p647_p3 = scmp.ne.s32.totalorder %s16_s13, %s646_s21  ;;  %p652_p5 = scmp.lt.s32.totalorder %s646_s21, %s646_s21 }
   0xb   :  { %p653_p6 = por %p652_p5, %p651_p4 }
   0xd   :  { %p654_p7 = pnand %p653_p6, %p647_p3 }
   0xf   :  { %657 = shalt.err (!%p654_p7)
}
  0x10   :  { %s685_s22 = smov 256   ;;  %s686_s23 = smov 16  }
  0x11   :  { %21 = dma.hbm_to_vmem [thread:$0]  %s870_s0, 4096, %s16_s13, [#allocation3], %s685_s22, %s685_s22, %s686_s23  }
  0x12   :  { %680 = dma.done.wait [#allocation3], 4096  }
  0x13   :  { %681 = vsyncadd [#allocation3], 4294963200  ;;  %v37_v0 = vld [vmem:[#allocation2 + $0x80] sm:$0xff]  ;;  %v53_v1 = vld [vmem:[#allocation2 + $0x88] sm:$0xff]  ;;  %vm688_vm0 = vmmov 0   ;;  %vm200_vm1 = vcmask 130112  }
  0x14   :  { %v29_v2 = vld [vmem:[#allocation2] sm:$0xff]  ;;  %v69_v3 = vadd.f32 %v53_v1, %v37_v0  ;;  %v45_v4 = vld [vmem:[#allocation2 + $0x8] sm:$0xff]  ;;  %v38_v5 = vld [vmem:[#allocation2 + $0x90] sm:$0xff]  ;;  %v85_v27 = vmax.f32 %v37_v0, %v53_v1  ;;  %vm207_vm2 = vcmask 195712   ;;  %vm214_vm3 = vcmask 261312   ;;  %s690_s15 = smov [#allocation5]  }
  0x15   :  { %v54_v6 = vld [vmem:[#allocation2 + $0x98] sm:$0xff]  ;;  %v61_v7 = vadd.f32 %v45_v4, %v29_v2  ;;  %v30_v8 = vld [vmem:[#allocation2 + $0x10] sm:$0xff]  ;;  %v39_v12 = vld [vmem:[#allocation2 + $0xa0] sm:$0xff]  ;;  %v77_v25 = vmax.f32 %v29_v2, %v45_v4  ;;  %vm221_vm4 = vcmask 326912   ;;  %vm228_vm5 = vcmask 392512   ;;  %s565_s16 = sshll.u32 %s690_s15, 4  ;;  %s566_s16 = int_to_ptr.vmem [resolvable:$true] %s565_s16 }
  0x16   :  { %v46_v9 = vld [vmem:[#allocation2 + $0x18] sm:$0xff]  ;;  %109 = vadd.xlane.f32.xlu1 %v69_v3  ;;  %v70_v10 = vadd.f32 %v54_v6, %v38_v5  ;;  %v55_v13 = vld [vmem:[#allocation2 + $0xa8] sm:$0xff]  ;;  %v31_v14 = vld [vmem:[#allocation2 + $0x20] sm:$0xff]  ;;  %v86_v26 = vmax.f32 %v38_v5, %v54_v6  ;;  %v687_v3 = vmov 0.0|0.0   ;;  %vm235_vm6 = vcmask 458112   ;;  %p663_p9 = scmp.lt.s32.totalorder %s566_s16, %s566_s16 }
  0x17   :  { %93 = vadd.xlane.f32.xlu0 %v61_v7  ;;  %v62_v11 = vadd.f32 %v46_v9, %v30_v8  ;;  %v47_v15 = vld [vmem:[#allocation2 + $0x28] sm:$0xff]  ;;  %v71_v16 = vadd.f32 %v55_v13, %v39_v12  ;;  %v40_v18 = vld [vmem:[#allocation2 + $0xb0] sm:$0xff]  ;;  %v56_v19 = vld [vmem:[#allocation2 + $0xb8] sm:$0xff]  ;;  %v78_v24 = vmax.f32 %v30_v8, %v46_v9  ;;  %v87_v34 = vmax.f32 %v39_v12, %v55_v13 }
  0x18   :  { %v63_v17 = vadd.f32 %v47_v15, %v31_v14  ;;  %v32_v20 = vld [vmem:[#allocation2 + $0x30] sm:$0xff]  ;;  %v48_v21 = vld [vmem:[#allocation2 + $0x38] sm:$0xff]  ;;  %v72_v22 = vadd.f32 %v56_v19, %v40_v18  ;;  %v41_v28 = vld [vmem:[#allocation2 + $0xc0] sm:$0xff]  ;;  %v79_v35 = vmax.f32 %v31_v14, %v47_v15  ;;  %v88_v42 = vmax.f32 %v40_v18, %v56_v19  ;;  %613 = vmatprep.subr.bf16.mxu0 %v687_v3 }
  0x19   :  { %v64_v23 = vadd.f32 %v48_v21, %v32_v20  ;;  %v57_v29 = vld [vmem:[#allocation2 + $0xc8] sm:$0xff]  ;;  %v33_v30 = vld [vmem:[#allocation2 + $0x40] sm:$0xff]  ;;  %v42_v36 = vld [vmem:[#allocation2 + $0xd0] sm:$0xff]  ;;  %v80_v43 = vmax.f32 %v32_v20, %v48_v21  ;;  %v689_v13 = vmov 0.0   ;;  %vm242_vm7 = vcmask 523712  }
  0x1a   :  { %111 = vadd.xlane.f32.xlu1 %v70_v10  ;;  %v49_v31 = vld [vmem:[#allocation2 + $0x48] sm:$0xff]  ;;  %v73_v32 = vadd.f32 %v57_v29, %v41_v28  ;;  %v58_v37 = vld [vmem:[#allocation2 + $0xd8] sm:$0xff]  ;;  %v34_v38 = vld [vmem:[#allocation2 + $0x50] sm:$0xff]  ;;  %v89_v50 = vmax.f32 %v41_v28, %v57_v29  ;;  %605 = vmatprep.mubr.msk.f32.mxu0 %vm688_vm0, %v689_v13  ;;  %vm283_vm8 = vcmask 1041409   ;;  %vm380_vm9 = vcmask 1043459  }
  0x1b   :  { %95 = vadd.xlane.f32.xlu0 %v62_v11  ;;  %v65_v33 = vadd.f32 %v49_v31, %v33_v30  ;;  %v50_v39 = vld [vmem:[#allocation2 + $0x58] sm:$0xff]  ;;  %v74_v40 = vadd.f32 %v58_v37, %v42_v36  ;;  %v43_v44 = vld [vmem:[#allocation2 + $0xe0] sm:$0xff]  ;;  %v59_v45 = vld [vmem:[#allocation2 + $0xe8] sm:$0xff]  ;;  %v81_v51 = vmax.f32 %v33_v30, %v49_v31  ;;  %v90_v58 = vmax.f32 %v42_v36, %v58_v37 }
  0x1c   :  { %v66_v41 = vadd.f32 %v50_v39, %v34_v38  ;;  %v35_v46 = vld [vmem:[#allocation2 + $0x60] sm:$0xff]  ;;  %v51_v47 = vld [vmem:[#allocation2 + $0x68] sm:$0xff]  ;;  %v75_v48 = vadd.f32 %v59_v45, %v43_v44  ;;  %v44_v52 = vld [vmem:[#allocation2 + $0xf0] sm:$0xff]  ;;  %v82_v59 = vmax.f32 %v34_v38, %v50_v39  ;;  %v91_v60 = vmax.f32 %v43_v44, %v59_v45  ;;  %608 = vmatprep.subr.mxu1 %v689_v13 }
  0x1d   :  { %v67_v49 = vadd.f32 %v51_v47, %v35_v46  ;;  %v60_v53 = vld [vmem:[#allocation2 + $0xf8] sm:$0xff]  ;;  %v36_v54 = vld [vmem:[#allocation2 + $0x70] sm:$0xff]  ;;  %v83_v61 = vmax.f32 %v35_v46, %v51_v47  ;;  %v385_v0 = vld [vmem:[%s871_s1] sm:$0xff]  ;;  %610 = vmatprep.mubr.msk.f32.mxu1 %vm688_vm0, %v689_v13  ;;  %v189_v30 = vlaneseq  ;;  %vm383_vm10 = vcmask 1041408  }
  0x1e   :  { %113 = vadd.xlane.f32.xlu1 %v71_v16  ;;  %v52_v55 = vld [vmem:[#allocation2 + $0x78] sm:$0xff]  ;;  %v76_v56 = vadd.f32 %v60_v53, %v44_v52  ;;  %v92_v62 = vmax.f32 %v44_v52, %v60_v53  ;;  %v386_v1 = vld [vmem:[%s871_s1 + $0x8] sm:$0xff]  ;;  %v387_v4 = vld [vmem:[%s871_s1 + $0x10] sm:$0xff]  ;;  %vm393_vm11 = vcmask 523264   ;;  %vm473_vm12 = vcmask 1043456  }
  0x1f   :  { %97 = vadd.xlane.f32.xlu0 %v63_v17  ;;  %v68_v57 = vadd.f32 %v52_v55, %v36_v54  ;;  %v84_v63 = vmax.f32 %v36_v54, %v52_v55  ;;  %v614_v2 = vpack.c.bf16 %v386_v1, %v385_v0  ;;  %v388_v5 = vld [vmem:[%s871_s1 + $0x18] sm:$0xff]  ;;  %v389_v7 = vld [vmem:[%s871_s1 + $0x20] sm:$0xff]  ;;  %v390_v8 = vld [vmem:[%s871_s1 + $0x28] sm:$0xff]  ;;  %vm469_vm13 = vcmask 31744  }
  0x20   :  { %v617_v6 = vpack.c.bf16 %v388_v5, %v387_v4  ;;  %v620_v9 = vpack.c.bf16 %v390_v8, %v389_v7  ;;  %v391_v10 = vld [vmem:[%s871_s1 + $0x30] sm:$0xff]  ;;  %v392_v11 = vld [vmem:[%s871_s1 + $0x38] sm:$0xff]  ;;  %vm557_vm14 = vcmask 517120  }
  0x21   :  { %615 = vmatpush3.bf16.msra.mxu0 %v614_v2  ;;  %v623_v12 = vpack.c.bf16 %v392_v11, %v391_v10 }
  0x22   :  { %115 = vadd.xlane.f32.xlu1 %v72_v22  ;;  %616 = vmatprep.subr.bf16.mxu0 %v687_v3 }
  0x23   :  { %99 = vadd.xlane.f32.xlu0 %v64_v23 }
  0x25   :  { %618 = vmatpush3.bf16.msra.mxu0 %v617_v6 }
  0x26   :  { %127 = vmax.xlane.f32.xlu1 %v78_v24  ;;  %619 = vmatprep.subr.bf16.mxu0 %v687_v3 }
  0x27   :  { %125 = vmax.xlane.f32.xlu0 %v77_v25 }
  0x29   :  { %621 = vmatpush3.bf16.msra.mxu0 %v620_v9 }
  0x2a   :  { %143 = vmax.xlane.f32.xlu1 %v86_v26  ;;  %622 = vmatprep.subr.bf16.mxu0 %v687_v3 }
  0x2b   :  { %141 = vmax.xlane.f32.xlu0 %v85_v27 }
  0x2d   :  { %624 = vmatpush3.bf16.msra.mxu0 %v623_v12 }
  0x2e   :  { %117 = vadd.xlane.f32.xlu1 %v73_v32 }
  0x2f   :  { %101 = vadd.xlane.f32.xlu0 %v65_v33  ;;  %v190_v33 = vand.u32 127, %v189_v30 }
  0x31   :  { %v195_v36 = vadd.s32 4294967288, %v190_v33  ;;  %v202_v37 = vadd.s32 4294967280, %v190_v33  ;;  %v209_v39 = vadd.s32 4294967272, %v190_v33  ;;  %v216_v47 = vadd.s32 4294967264, %v190_v33 }
  0x32   :  { %145 = vmax.xlane.f32.xlu1 %v87_v34  ;;  %v192_v34 = vshrl.u32 %v189_v30, 7  ;;  %v230_v52 = vadd.s32 4294967248, %v190_v33 }
  0x33   :  { %129 = vmax.xlane.f32.xlu0 %v79_v35 }
  0x34   :  { %v767_v44 = vsub.s32 %v202_v37, %v192_v34  ;;  %v783_v4 = vsub.s32 %v230_v52, %v192_v34 }
  0x36   :  { %119 = vadd.xlane.f32.xlu1 %v74_v40  ;;  %v763_v40 = vsub.s32 %v190_v33, %v192_v34 }
  0x37   :  { %103 = vadd.xlane.f32.xlu0 %v66_v41 }
  0x3a   :  { %147 = vmax.xlane.f32.xlu1 %v88_v42  ;;  %v765_v42 = vsub.s32 %v195_v36, %v192_v34 }
  0x3b   :  { %131 = vmax.xlane.f32.xlu0 %v80_v43 }
  0x3e   :  { %121 = vadd.xlane.f32.xlu1 %v75_v48  ;;  %v223_v48 = vadd.s32 4294967256, %v190_v33 }
  0x3f   :  { %105 = vadd.xlane.f32.xlu0 %v67_v49 }
  0x40   :  { %v779_v0 = vsub.s32 %v223_v48, %v192_v34 }
  0x42   :  { %149 = vmax.xlane.f32.xlu1 %v89_v50 }
  0x43   :  { %133 = vmax.xlane.f32.xlu0 %v81_v51  ;;  %v769_v51 = vsub.s32 %v209_v39, %v192_v34 }
  0x46   :  { %123 = vadd.xlane.f32.xlu1 %v76_v56 }
  0x47   :  { %107 = vadd.xlane.f32.xlu0 %v68_v57  ;;  %v237_v57 = vadd.s32 4294967240, %v190_v33 }
  0x49   :  { %v788_v8 = vsub.s32 %v237_v57, %v192_v34 }
  0x4a   :  { %151 = vmax.xlane.f32.xlu1 %v90_v58 }
  0x4b   :  { %135 = vmax.xlane.f32.xlu0 %v82_v59 }
  0x4e   :  { %153 = vmax.xlane.f32.xlu1 %v91_v60 }
  0x4f   :  { %137 = vmax.xlane.f32.xlu0 %v83_v61 }
  0x52   :  { %155 = vmax.xlane.f32.xlu1 %v92_v62  ;;  %v777_v62 = vsub.s32 %v216_v47, %v192_v34 }
  0x53   :  { %139 = vmax.xlane.f32.xlu0 %v84_v63 }
  0xa3   :  { %v110_v14 = vpop.xlane.xlu1 %109 }
  0xa4   :  { %v94_v15 = vpop.xlane.xlu0 %93  ;;  %v165_v49 = vmul.f32 0.00390625, %v110_v14 }
  0xa5   :  { %v157_v53 = vmul.f32 0.00390625, %v94_v15 }
  0xa6   :  { %v247_v1 = vrot.slane %v165_v49, %v763_v40 }
  0xa7   :  { %v112_v16 = vpop.xlane.xlu1 %111  ;;  %v194_v5 = vrot.slane %v157_v53, %v763_v40 }
  0xa8   :  { %v96_v17 = vpop.xlane.xlu0 %95  ;;  %v166_v43 = vmul.f32 0.00390625, %v112_v16 }
  0xa9   :  { %v158_v46 = vmul.f32 0.00390625, %v96_v17 }
  0xaa   :  { %v251_v58 = vrot.slane %v166_v43, %v765_v42 }
  0xab   :  { %v114_v18 = vpop.xlane.xlu1 %113  ;;  %v199_v61 = vrot.slane %v158_v46, %v765_v42 }
  0xac   :  { %v98_v19 = vpop.xlane.xlu0 %97  ;;  %v167_v50 = vmul.f32 0.00390625, %v114_v18  ;;  %v252_v10 = vsel %vm200_vm1, %v251_v58, %v247_v1 }
  0xad   :  { %v159_v54 = vmul.f32 0.00390625, %v98_v19  ;;  %v201_v15 = vsel %vm200_vm1, %v199_v61, %v194_v5 }
  0xae   :  { %v256_v2 = vrot.slane %v167_v50, %v767_v44 }
  0xaf   :  { %v116_v20 = vpop.xlane.xlu1 %115  ;;  %v206_v6 = vrot.slane %v159_v54, %v767_v44 }
  0xb0   :  { %v100_v21 = vpop.xlane.xlu0 %99  ;;  %v168_v55 = vmul.f32 0.00390625, %v116_v20  ;;  %v257_v19 = vsel %vm207_vm2, %v256_v2, %v252_v10 }
  0xb1   :  { %v160_v59 = vmul.f32 0.00390625, %v100_v21 }
  0xb2   :  { %v261_v7 = vrot.slane %v168_v55, %v769_v51 }
  0xb3   :  { %v747_v22 = vpop.xlane.xlu1 %127  ;;  %v213_v11 = vrot.slane %v160_v59, %v769_v51 }
  0xb4   :  { %v749_v23 = vpop.xlane.xlu0 %125  ;;  %v309_v12 = vrot.slane %v747_v22, %v765_v42 }
  0xb5   :  { %v305_v13 = vrot.slane %v749_v23, %v763_v40  ;;  %v208_v23 = vsel %vm207_vm2, %v206_v6, %v201_v15 }
  0xb7   :  { %v751_v24 = vpop.xlane.xlu1 %143 }
  0xb8   :  { %v753_v25 = vpop.xlane.xlu0 %141  ;;  %v348_v16 = vrot.slane %v751_v24, %v765_v42  ;;  %v215_v24 = vsel %vm214_vm3, %v213_v11, %v208_v23 }
  0xb9   :  { %v344_v17 = vrot.slane %v753_v25, %v763_v40  ;;  %v310_v25 = vsel %vm200_vm1, %v309_v12, %v305_v13 }
  0xbb   :  { %v118_v26 = vpop.xlane.xlu1 %117  ;;  %v349_v39 = vsel %vm200_vm1, %v348_v16, %v344_v17  ;;  %v468_v16 = vld [vmem:[%s872_s2] sm:$0xf]  ;;  %s658_s2 = scalar_lea.vmem %s566_s16, 32 }
  0xbc   :  { %v102_v27 = vpop.xlane.xlu0 %101  ;;  %v169_v63 = vmul.f32 0.00390625, %v118_v26  ;;  %v262_v26 = vsel %vm214_vm3, %v261_v7, %v257_v19  ;;  %609 = vmatpush3.msk.msra.mxu1 %vm473_vm12, %v468_v16  ;;  %p659_p8 = scmp.ne.s32.totalorder %s566_s16, %s658_s2  ;;  %p664_p10 = scmp.lt.s32.totalorder %s658_s2, %s658_s2 }
  0xbd   :  { %v161_v3 = vmul.f32 0.00390625, %v102_v27 }
  0xbe   :  { %v266_v18 = vrot.slane %v169_v63, %v777_v62  ;;  %p665_p11 = por %p664_p10, %p663_p9 }
  0xbf   :  { %v755_v28 = vpop.xlane.xlu1 %145  ;;  %v220_v20 = vrot.slane %v161_v3, %v777_v62 }
  0xc0   :  { %v757_v29 = vpop.xlane.xlu0 %129  ;;  %v353_v34 = vrot.slane %v755_v28, %v767_v44  ;;  %p666_p12 = pnand %p665_p11, %p659_p8 }
  0xc2   :  { %v354_v48 = vsel %vm207_vm2, %v353_v34, %v349_v39 }
  0xc3   :  { %v120_v31 = vpop.xlane.xlu1 %119 }
  0xc4   :  { %v104_v32 = vpop.xlane.xlu0 %103  ;;  %v170_v21 = vmul.f32 0.00390625, %v120_v31  ;;  %v267_v31 = vsel %vm221_vm4, %v266_v18, %v262_v26 }
  0xc5   :  { %v162_v22 = vmul.f32 0.00390625, %v104_v32  ;;  %v314_v32 = vrot.slane %v757_v29, %v767_v44 }
  0xc6   :  { %v271_v42 = vrot.slane %v170_v21, %v779_v0 }
  0xc7   :  { %v759_v35 = vpop.xlane.xlu1 %147  ;;  %v227_v43 = vrot.slane %v162_v22, %v779_v0 }
  0xc8   :  { %v761_v38 = vpop.xlane.xlu0 %131  ;;  %v358_v28 = vrot.slane %v759_v35, %v769_v51  ;;  %v272_v55 = vsel %vm228_vm5, %v271_v42, %v267_v31 }
  0xca   :  { %v359_v57 = vsel %vm214_vm3, %v358_v28, %v354_v48 }
  0xcb   :  { %v122_v41 = vpop.xlane.xlu1 %121 }
  0xcc   :  { %v106_v45 = vpop.xlane.xlu0 %105  ;;  %v171_v27 = vmul.f32 0.00390625, %v122_v41  ;;  %v222_v41 = vsel %vm221_vm4, %v220_v20, %v215_v24 }
  0xcd   :  { %v163_v30 = vmul.f32 0.00390625, %v106_v45  ;;  %v319_v45 = vrot.slane %v761_v38, %v769_v51  ;;  %v315_v38 = vsel %vm207_vm2, %v314_v32, %v310_v25 }
  0xce   :  { %v276_v46 = vrot.slane %v171_v27, %v783_v4 }
  0xcf   :  { %v771_v56 = vpop.xlane.xlu1 %149  ;;  %v234_v47 = vrot.slane %v163_v30, %v783_v4  ;;  %v320_v59 = vsel %vm214_vm3, %v319_v45, %v315_v38 }
  0xd0   :  { %v774_v60 = vpop.xlane.xlu0 %133  ;;  %v363_v29 = vrot.slane %v771_v56, %v777_v62  ;;  %v229_v56 = vsel %vm228_vm5, %v227_v43, %v222_v41 }
  0xd1   :  { %v324_v49 = vrot.slane %v774_v60, %v777_v62  ;;  %v277_v60 = vsel %vm235_vm6, %v276_v46, %v272_v55  ;;  %v236_v61 = vsel %vm235_vm6, %v234_v47, %v229_v56 }
  0xd2   :  { %v364_v62 = vsel %vm221_vm4, %v363_v29, %v359_v57 }
  0xd3   :  { %v124_v9 = vpop.xlane.xlu1 %123 }
  0xd4   :  { %v108_v14 = vpop.xlane.xlu0 %107  ;;  %v172_v36 = vmul.f32 0.00390625, %v124_v9 }
  0xd5   :  { %v164_v40 = vmul.f32 0.00390625, %v108_v14 }
  0xd6   :  { %v281_v50 = vrot.slane %v172_v36, %v788_v8 }
  0xd7   :  { %v152_v33 = vpop.xlane.xlu1 %151  ;;  %v241_v51 = vrot.slane %v164_v40, %v788_v8 }
  0xd8   :  { %v136_v37 = vpop.xlane.xlu0 %135  ;;  %v368_v35 = vrot.slane %v152_v33, %v779_v0  ;;  %v282_v1 = vsel %vm242_vm7, %v281_v50, %v277_v60 }
  0xd9   :  { %v329_v53 = vrot.slane %v136_v37, %v779_v0  ;;  %v325_v0 = vsel %vm221_vm4, %v324_v49, %v320_v59 }
  0xda   :  { %v369_v2 = vsel %vm228_vm5, %v368_v35, %v364_v62 }
  0xdb   :  { %v154_v44 = vpop.xlane.xlu1 %153  ;;  %v330_v6 = vsel %vm228_vm5, %v329_v53, %v325_v0 }
  0xdc   :  { %v138_v52 = vpop.xlane.xlu0 %137  ;;  %v373_v54 = vrot.slane %v154_v44, %v783_v4 }
  0xdd   :  { %v334_v58 = vrot.slane %v138_v52, %v783_v4  ;;  %v243_v4 = vsel %vm242_vm7, %v241_v51, %v236_v61 }
  0xde   :  { %v374_v7 = vsel %vm235_vm6, %v373_v54, %v369_v2  ;;  %v284_v13 = vsel %vm283_vm8, %v282_v1, %v243_v4 }
  0xdf   :  { %v156_v63 = vpop.xlane.xlu1 %155  ;;  %v335_v10 = vsel %vm235_vm6, %v334_v58, %v330_v6 }
  0xe0   :  { %v378_v3 = vrot.slane %v156_v63, %v788_v8  ;;  %v140_v5 = vpop.xlane.xlu0 %139 }
  0xe1   :  { %v339_v9 = vrot.slane %v140_v5, %v788_v8 }
  0xe2   :  { %v379_v11 = vsel %vm242_vm7, %v378_v3, %v374_v7 }
  0xe3   :  { %v340_v12 = vsel %vm242_vm7, %v339_v9, %v335_v10 }
  0xe4   :  { %v381_v14 = vsel %vm380_vm9, %v379_v11, %v340_v12 }
  0xe5   :  { %v384_v15 = vsel %vm383_vm10, %v284_v13, %v381_v14 }
  0xe6   :  { %606 = vmatmul.mubr.msk.f32.vlgmr.msra.gmra.mrb[0].mxu0 %vm393_vm11, %v384_v15 }
 0x1b9   :  { %v463_v8 = vpop.f32.mrb[0].mxu0 }
 0x1ba   :  { %v467_v17 = vmax.f32 %v463_v8, 0.0  ;;  %v607_v18 = vpop.f32.mrb[1].mxu0 }
 0x1bc   :  { %611 = vmatmul.mubr.msk.f32.vlgmr.msra.gmra.mrb[0].mxu1 %vm469_vm13, %v467_v17 }
 0x28f   :  { %v543_v19 = vpop.f32.mrb[0].mxu1 }
 0x290   :  { %v548_v20 = vrot.slane %v543_v19, 2  ;;  %v612_v21 = vpop.f32.mrb[1].mxu1 }
 0x292   :  { %v550_v22 = vadd.f32 %v548_v20, %v543_v19 }
 0x294   :  { %v577_v23 = vmul.f32 -1.442695, %v550_v22 }
 0x296   :  { %632 = vpow2.f32 %v577_v23 }
 0x2a0   :  { %v633_v26 = vpop.eup %632 }
 0x2a1   :  { %v554_v27 = vadd.f32 1.0, %v633_v26 }
 0x2a3   :  { %634 = vrcp.f32 %v554_v27 }
 0x2ad   :  { %v635_v30 = vpop.eup %634 }
 0x2ae   :  { %558 = vst.msk [vmem:[#allocation5] sm:$0x3] %vm557_vm14, %v635_v30 }
 0x2af   :  { %669 = shalt.err (!%p666_p12)
}
 0x2b0   :  { %s670_s19 = scalar_lea.hbm %s873_s3, 32 }
 0x2b1   :  { %p671_p13 = scmp.ne.s32.totalorder %s873_s3, %s670_s19  ;;  %p674_p0 = scmp.lt.u32.totalorder %s670_s19, %s873_s3 }
 0x2b3   :  { %p676_p1 = pnand %p674_p0, %p671_p13 }
 0x2b5   :  { %679 = shalt.err (!%p676_p1)
}
 0x2b6   :  { %568 = dma.vmem_to_hbm [thread:$0]  %s566_s16, 32, %s873_s3, [#allocation4]  }
 0x2b7   :  { %682 = dma.done.wait [#allocation4], 32  }
 0x2b8   :  { %683 = vsyncadd [#allocation4], 4294967264 }
 0x2b9   :  { %572 = vsyncpa [#allocation3], 1 }
 0x2ba   :  { %573 = vsyncpa [#allocation4], 1 }

</bundles_post_ra>
